<compile_context>
chip_gen: v5e
topology: v5e:2x2
jax: 0.10.0
libtpu: 0.0.40
codegen_flags: <defaults>
</compile_context>

<pallas_src>
import jax
import jax.numpy as jnp
from jax.experimental import pallas as pl
from jax.experimental.pallas import tpu as pltpu


def silog_std_kernel(value_ref, o_ref):
    # Straight VMEM copy of the parameter to the output tile.
    o_ref[...] = value_ref[...]


def silog_std_forward(x, value):
    """Forward of SILogStd: returns `value` (shape (nh,)); `x` is unused.

    `x` is accepted to mirror the PyTorch module signature but is deliberately
    not fed to the pallas_call (no wasted DMA for an unused operand).
    """
    del x  # unused by the module's forward
    nh = value.shape[0]
    value_2d = value.reshape(1, nh)

    vmem = pl.BlockSpec(memory_space=pltpu.MemorySpace.VMEM)
    out_2d = pl.pallas_call(
        silog_std_kernel,
        out_shape=jax.ShapeDtypeStruct((1, nh), value.dtype),
        in_specs=[vmem],
        out_specs=vmem,
    )(value_2d)
    return out_2d.reshape(nh)


def silog_std_reference(x, value):
    """Pure-JAX reference mirroring the PyTorch forward exactly."""
    del x
    return value


if __name__ == "__main__":
    ni, nh = 16, 32
    key = jax.random.PRNGKey(0)

    # Parameter exactly as the module initializes it: ones(nh) * 0.001.
    value = jnp.ones((nh,), jnp.float32) * 0.001
    # Example input (ignored by the forward), small shape consistent with use.
    x = jax.random.normal(key, (4, nh), jnp.float32)

    out = silog_std_forward(x, value)
    out = jax.block_until_ready(out)

    ref = silog_std_reference(x, value)
    assert out.shape == (nh,)
    assert out.dtype == value.dtype
    assert jnp.allclose(out, ref, atol=0.0, rtol=0.0), "mismatch vs reference"

    print("KERNEL_OK")
</pallas_src>

<mosaic_0001>
module attributes {stable_mosaic.version = 11 : i64} {
  func.func @silog_std_kernel(%arg0: memref<1x32xf32, #tpu.memory_space<vmem>>, %arg1: memref<1x32xf32, #tpu.memory_space<vmem>>) attributes {dimension_semantics = [], scalar_prefetch = 0 : i64, scratch_operands = 0 : i64, tpu.core_type = #tpu.core_type<tc>} {
    %c0 = arith.constant 0 : index
    %c0_0 = arith.constant 0 : index
    %0 = vector.load %arg0[%c0, %c0_0] : memref<1x32xf32, #tpu.memory_space<vmem>>, vector<1x32xf32>
    %c0_1 = arith.constant 0 : index
    %c0_2 = arith.constant 0 : index
    %1 = vector.load %arg1[%c0_1, %c0_2] : memref<1x32xf32, #tpu.memory_space<vmem>>, vector<1x32xf32>
    tpu.vector_store %arg1[%c0_1, %c0_2], %0 {strides = array<i32>} : memref<1x32xf32, #tpu.memory_space<vmem>>, vector<1x32xf32>,
    return
  }
}

</mosaic_0001>

<bundles_post_ra>
// kernel: tpu_custom_call.1
= control target key start
LH: loop header
LB: loop body
LE: loop exit
PB: predicated region body
PF: predicated region fallthrough
CT: control target
= control target key end

     0   :  { %6 = vsyncpa [#allocation3], 0  ;;  %s115_s0 = inlined_call_operand.hbm [shape: f32[1,32], index: 0, kind: input, shape index: {}]   ;;  %s116_s1 = inlined_call_operand.hbm [shape: f32[1,32], index: 1, kind: output, shape index: {}]  }
   0x1   :  { %7 = vsyncpa [#allocation4], 0  ;;  %s13_s8 = sshll.u32 %s115_s0, 4  ;;  %s97_s9 = smov [#allocation2]   ;;  %s14_s8 = int_to_ptr.hbm [resolvable:$true] %s13_s8 }
   0x2   :  { %s15_s10 = sshll.u32 %s97_s9, 4  ;;  %s16_s10 = int_to_ptr.vmem [resolvable:$true] %s15_s10 }
   0x3   :  { %18 = dma.hbm_to_vmem [thread:$0]  %s14_s8, 16, %s16_s10, [#allocation3]  }
   0x4   :  { %93 = dma.done.wait [#allocation3], 16  }
   0x5   :  { %94 = vsyncadd [#allocation3], 4294967280  ;;  %s98_s11 = smov [#allocation5]   ;;  %s33_s15 = sshll.u32 %s116_s1, 4  ;;  %vm24_vm0 = vcmask 253952   ;;  %s34_s15 = int_to_ptr.hbm [resolvable:$true] %s33_s15 }
   0x6   :  { %s31_s12 = sshll.u32 %s98_s11, 4  ;;  %v23_v0 = vld [vmem:[#allocation2] sm:$0x1]  ;;  %s32_s12 = int_to_ptr.vmem [resolvable:$true] %s31_s12 }
   0x7   :  { %25 = vst.msk [vmem:[#allocation5] sm:$0x1] %vm24_vm0, %v23_v0 }
   0x8   :  { %36 = dma.vmem_to_hbm [thread:$0]  %s32_s12, 16, %s34_s15, [#allocation4]  }
   0x9   :  { %95 = dma.done.wait [#allocation4], 16  }
   0xa   :  { %96 = vsyncadd [#allocation4], 4294967280 }
   0xb   :  { %41 = vsyncpa [#allocation3], 1 }
   0xc   :  { %42 = vsyncpa [#allocation4], 1 }

</bundles_post_ra>
